<compile_context>
chip_gen: v7x
topology: tpu7x:2x2x1
jax: 0.10.0
libtpu: 0.0.40
codegen_flags: <defaults>
</compile_context>

<pallas_src>
import jax
import jax.numpy as jnp
from jax.experimental import pallas as pl
from jax.experimental.pallas import tpu as pltpu

LANES = 128
SUBLANES = 8


def _affine_kernel(ab_ref, x_ref, o_ref):
    # ab_ref: (2,) f32 in SMEM -> [a, b]; x_ref / o_ref: lane-dense 2-D VMEM tiles
    a = ab_ref[0]
    b = ab_ref[1]
    # single VPU multiply-add per vreg; cast keeps it dtype-robust (bf16 etc.)
    o_ref[...] = (b * x_ref[...] + a).astype(o_ref.dtype)


def my_model_forward(a, b, x, *, tile_rows=512, wide_lanes=1024,
                     small_elems_max=1 << 20):
    """Forward of MyModel: y = a + b * x with scalar params a, b (shape (1,))."""
    orig_shape = x.shape
    orig_dtype = x.dtype
    n = x.size

    # Pack both scalar parameters into a single tiny 1-D SMEM operand.
    ab = jnp.concatenate([jnp.ravel(a), jnp.ravel(b)]).astype(jnp.float32)
    xf = jnp.ravel(x)

    if n <= small_elems_max:
        # Tiny / medium input: one VMEM block, no grid -> no pipeline machinery.
        chunk = SUBLANES * LANES
        n_pad = pl.cdiv(n, chunk) * chunk
        if n_pad != n:
            xf = jnp.pad(xf, (0, n_pad - n))
        rows = n_pad // LANES
        x2d = xf.reshape(rows, LANES)
        out2d = pl.pallas_call(
            _affine_kernel,
            out_shape=jax.ShapeDtypeStruct((rows, LANES), orig_dtype),
            in_specs=[
                pl.BlockSpec(memory_space=pltpu.SMEM),   # ab, shape (2,)
                pl.BlockSpec(memory_space=pltpu.VMEM),   # x, full array
            ],
            out_specs=pl.BlockSpec(memory_space=pltpu.VMEM),
        )(ab, x2d)
    else:
        # Large input: wide lane-dense slab, 1-D row grid, parallel semantics.
        chunk = tile_rows * wide_lanes
        n_pad = pl.cdiv(n, chunk) * chunk
        if n_pad != n:
            xf = jnp.pad(xf, (0, n_pad - n))
        rows = n_pad // wide_lanes
        x2d = xf.reshape(rows, wide_lanes)
        out2d = pl.pallas_call(
            _affine_kernel,
            out_shape=jax.ShapeDtypeStruct((rows, wide_lanes), orig_dtype),
            grid=(rows // tile_rows,),
            in_specs=[
                pl.BlockSpec(memory_space=pltpu.SMEM),                   # ab (2,)
                pl.BlockSpec((tile_rows, wide_lanes), lambda i: (i, 0)),  # x tile
            ],
            out_specs=pl.BlockSpec((tile_rows, wide_lanes), lambda i: (i, 0)),
            compiler_params=pltpu.CompilerParams(
                dimension_semantics=("parallel",)),
        )(ab, x2d)

    return jnp.ravel(out2d)[:n].reshape(orig_shape)


if __name__ == "__main__":
    key = jax.random.PRNGKey(0)
    k_a, k_b, k_x = jax.random.split(key, 3)

    # Parameters: same shapes as torch.nn.Parameter(torch.randn(1)) in __init__
    a = jax.random.normal(k_a, (1,), dtype=jnp.float32)
    b = jax.random.normal(k_b, (1,), dtype=jnp.float32)

    # Input: small NCHW tensor consistent with the elementwise forward
    x = jax.random.normal(k_x, (2, 4, 16, 16), dtype=jnp.float32)

    y = my_model_forward(a, b, x)
    y = jax.block_until_ready(y)

    # Correctness check against the pure-JAX reference of the torch forward
    y_ref = a[0] + b[0] * x
    assert y.shape == x.shape and y.dtype == x.dtype
    assert jnp.allclose(y, y_ref, atol=1e-6, rtol=1e-6)

    # Also exercise the tiled (grid) path once, still at a small shape, by
    # forcing the threshold to zero — keeps both code paths verified on-device.
    x2 = jax.random.normal(k_x, (8, 64, 64), dtype=jnp.float32)
    y2 = jax.block_until_ready(my_model_forward(a, b, x2, small_elems_max=0))
    assert jnp.allclose(y2, a[0] + b[0] * x2, atol=1e-6, rtol=1e-6)

    print("KERNEL_OK")
</pallas_src>

<mosaic_0001>
module attributes {stable_mosaic.version = 11 : i64} {
  func.func @_affine_kernel(%arg0: memref<2xf32, #tpu.memory_space<smem>>, %arg1: memref<16x128xf32, #tpu.memory_space<vmem>>, %arg2: memref<16x128xf32, #tpu.memory_space<vmem>>) attributes {dimension_semantics = [], scalar_prefetch = 0 : i64, scratch_operands = 0 : i64, tpu.core_type = #tpu.core_type<tc>} {
    %c0 = arith.constant 0 : index
    %0 = memref.load %arg0[%c0] : memref<2xf32, #tpu.memory_space<smem>>
    %c1 = arith.constant 1 : index
    %1 = memref.load %arg0[%c1] : memref<2xf32, #tpu.memory_space<smem>>
    %c0_0 = arith.constant 0 : index
    %c0_1 = arith.constant 0 : index
    %2 = vector.load %arg1[%c0_0, %c0_1] : memref<16x128xf32, #tpu.memory_space<vmem>>, vector<16x128xf32>
    %3 = vector.broadcast %1 : f32 to vector<16x128xf32>
    %4 = arith.mulf %3, %2 : vector<16x128xf32>
    %5 = vector.broadcast %0 : f32 to vector<16x128xf32>
    %6 = arith.addf %4, %5 : vector<16x128xf32>
    %c0_2 = arith.constant 0 : index
    %c0_3 = arith.constant 0 : index
    %7 = vector.load %arg2[%c0_2, %c0_3] : memref<16x128xf32, #tpu.memory_space<vmem>>, vector<16x128xf32>
    tpu.vector_store %arg2[%c0_2, %c0_3], %6 {strides = array<i32>} : memref<16x128xf32, #tpu.memory_space<vmem>>, vector<16x128xf32>,
    return
  }
}

</mosaic_0001>

<bundles_post_ra>
// kernel: tpu_custom_call.1
= control target key start
LH: loop header
LB: loop body
LE: loop exit
PB: predicated region body
PF: predicated region fallthrough
CT: control target
= control target key end

     0   :  { %7 = vsyncpa [#allocation5], 0  ;;  %s195_s0 = inlined_call_operand.hbm [shape: f32[2], index: 0, kind: input, shape index: {}]   ;;  %s196_s1 = inlined_call_operand.hbm [shape: f32[16,128], index: 1, kind: input, shape index: {}]   ;;  %s197_s2 = inlined_call_operand.hbm [shape: f32[16,128], index: 2, kind: output, shape index: {}]  }
   0x1   :  { %8 = vsyncpa [#allocation3], 0 }
   0x2   :  { %9 = vsyncpa [#allocation4], 0  ;;  %s73_s11 = scalar_lea.hbm %s195_s0, 16 }
   0x3   :  { %p74_p0 = scmp.ne.s32.totalorder %s195_s0, %s73_s11  ;;  %p77_p1 = scmp.lt.u32.totalorder %s73_s11, %s195_s0 }
   0x5   :  { %p79_p2 = pnand %p77_p1, %p74_p0 }
   0x7   :  { %82 = shalt.err (!%p79_p2)
}
   0x8   :  { %s133_s16 = smov [#allocation2]   ;;  %s134_s19 = smov [#allocation6]  }
   0x9   :  { %17 = dma.hbm_to_smem %s195_s0, 16, %s133_s16, [#allocation5]  }
   0xa   :  { %s23_s20 = sshll.u32 %s134_s19, 4  ;;  %s83_s23 = scalar_lea.hbm %s196_s1, 256  ;;  %s24_s20 = int_to_ptr.vmem [resolvable:$true] %s23_s20 }
   0xb   :  { %p84_p3 = scmp.ne.s32.totalorder %s196_s1, %s83_s23  ;;  %p87_p4 = scmp.lt.u32.totalorder %s83_s23, %s196_s1 }
   0xd   :  { %p89_p5 = pnand %p87_p4, %p84_p3 }
   0xf   :  { %92 = shalt.err (!%p89_p5)
}
  0x10   :  { %s93_s28 = scalar_lea.vmem %s24_s20, 256  ;;  %p98_p7 = scmp.lt.s32.totalorder %s24_s20, %s24_s20 }
  0x11   :  { %p94_p6 = scmp.ne.s32.totalorder %s24_s20, %s93_s28  ;;  %p99_p8 = scmp.lt.s32.totalorder %s93_s28, %s93_s28 }
  0x13   :  { %p100_p9 = por %p99_p8, %p98_p7 }
  0x15   :  { %p101_p10 = pnand %p100_p9, %p94_p6 }
  0x17   :  { %104 = shalt.err (!%p101_p10)
}
  0x18   :  { %s135_s0 = smov 128   ;;  %s136_s29 = smov 8  }
  0x19   :  { %29 = dma.hbm_to_vmem [thread:$0]  %s196_s1, 256, %s24_s20, [#allocation3], %s135_s0, %s135_s0, %s136_s29  }
  0x1a   :  { %127 = dma.done.wait [#allocation5], 16  }
  0x1b   :  { %128 = vsyncadd [#allocation5], 4294967280 }
  0x1c   :  { %129 = dma.done.wait [#allocation3], 256  }
  0x1d   :  { %130 = vsyncadd [#allocation3], 4294967040 }
  0x1e   :  { %36 = sfence }
  0x1f   :  { %s37_s4 = sld [smem:[#allocation2]]  ;;  %s67_s5 = sld [smem:[#allocation2 + $0x1]]  ;;  %v39_v0 = vld [vmem:[#allocation6] sm:$0xff]  ;;  %v40_v1 = vld [vmem:[#allocation6 + $0x8] sm:$0xff] }
  0x20   :  { %s137_s6 = smov [#allocation7]  }
  0x21   :  { %s54_s7 = sshll.u32 %s137_s6, 4  ;;  %s55_s7 = int_to_ptr.vmem [resolvable:$true] %s54_s7 }
  0x22   :  { %s105_s1 = scalar_lea.vmem %s55_s7, 256  ;;  %p110_p12 = scmp.lt.s32.totalorder %s55_s7, %s55_s7 }
  0x23   :  { %p106_p11 = scmp.ne.s32.totalorder %s55_s7, %s105_s1  ;;  %p111_p13 = scmp.lt.s32.totalorder %s105_s1, %s105_s1 }
  0x25   :  { %v41_v2 = vstv %s67_s5  ;;  %v44_v3 = vstv %s37_s4  ;;  %p112_p0 = por %p111_p13, %p110_p12 }
  0x26   :  { %v42_v4 = vmul.f32 %v41_v2, %v39_v0  ;;  %v43_v5 = vmul.f32 %v41_v2, %v40_v1 }
  0x27   :  { %p113_p1 = pnand %p112_p0, %p106_p11 }
  0x28   :  { %v45_v6 = vadd.f32 %v44_v3, %v42_v4  ;;  %v46_v7 = vadd.f32 %v44_v3, %v43_v5 }
  0x2a   :  { %47 = vst [vmem:[#allocation7] sm:$0xff] %v45_v6  ;;  %48 = vst [vmem:[#allocation7 + $0x8] sm:$0xff] %v46_v7 }
  0x2b   :  { %116 = shalt.err (!%p113_p1)
}
  0x2c   :  { %s117_s10 = scalar_lea.hbm %s197_s2, 256 }
  0x2d   :  { %p118_p2 = scmp.ne.s32.totalorder %s197_s2, %s117_s10  ;;  %p121_p3 = scmp.lt.u32.totalorder %s117_s10, %s197_s2 }
  0x2f   :  { %p123_p4 = pnand %p121_p3, %p118_p2 }
  0x31   :  { %126 = shalt.err (!%p123_p4)
}
  0x32   :  { %60 = dma.vmem_to_hbm [thread:$0]  %s55_s7, 256, %s197_s2, [#allocation4], %s135_s0, %s135_s0, %s136_s29  }
  0x33   :  { %131 = dma.done.wait [#allocation4], 256  }
  0x34   :  { %132 = vsyncadd [#allocation4], 4294967040 }
  0x35   :  { %64 = vsyncpa [#allocation3], 1 }
  0x36   :  { %65 = vsyncpa [#allocation4], 1 }
  0x37   :  { %66 = vsyncpa [#allocation5], 1 }

</bundles_post_ra>
